<compile_context>
chip_gen: v7x
topology: tpu7x:2x2x1
jax: 0.10.0
libtpu: 0.0.40
codegen_flags: <defaults>
</compile_context>

<pallas_src>
import jax
import jax.numpy as jnp
from jax import lax
from jax.experimental import pallas as pl
from jax.experimental.pallas import tpu as pltpu


def _round_up(x, m):
    return (x + m - 1) // m * m


def _largest_tile(dim, cap, quantum):
    """Largest multiple of `quantum` <= min(cap, dim) that divides `dim`.

    `dim` is always a multiple of `quantum`, so a valid tile always exists.
    """
    best = quantum
    t = quantum
    limit = min(cap, dim)
    while t <= limit:
        if dim % t == 0:
            best = t
        t += quantum
    return best


def _zoom_kernel(x_ref, w_ref, shift_ref, o_ref):
    """One (branch, row-tile, out-feature-tile) block; accumulates over K axis.

    The f32 output tile stays resident in VMEM across the K axis (its block
    index is constant in k), so we accumulate straight into it: initialized
    with the fused Linear-bias + BatchNorm shift, then matmul partials added.
    """
    k = pl.program_id(3)

    @pl.when(k == 0)
    def _():
        o_ref[0] = jnp.broadcast_to(shift_ref[0], o_ref.shape[1:])

    # x:(tm,tk) contracted with W':(tn,tk) on dim 1  ==  x @ W'^T.
    # The MXU consumes the transposed operand natively; no wrapper-side W.T.
    o_ref[0] += lax.dot_general(
        x_ref[0], w_ref[0],
        dimension_numbers=(((1,), (1,)), ((), ())),
        preferred_element_type=jnp.float32)


def pack_private_zoom_params(params, *, weight_dtype=jnp.bfloat16, eps=1e-5):
    """One-time weight preparation (do NOT call per forward).

    Folds BatchNorm (eval) scale into the weight rows, the Linear bias into the
    BN shift, pads H only up to a multiple of 128, casts weights to
    `weight_dtype`, and stacks the text/image branches on a leading axis.
    """
    H = params["W_t"].shape[0]
    Hp = _round_up(H, 128)

    scale = params["gamma"] * lax.rsqrt(params["running_var"] + eps)   # (H,)
    bn_shift = params["beta"] - params["running_mean"] * scale         # (H,)

    def fold(W, b):
        Wf = W * scale[:, None]                 # scale per output feature row
        sh = b * scale + bn_shift               # fused bias + BN shift
        Wp = jnp.pad(Wf, ((0, Hp - H), (0, Hp - H))).astype(weight_dtype)
        sp = jnp.pad(sh, (0, Hp - H)).astype(jnp.float32)
        return Wp, sp

    Wt, st = fold(params["W_t"], params["b_t"])
    Wv, sv = fold(params["W_v"], params["b_v"])

    return {
        "w": jnp.stack([Wt, Wv]),                        # (2, Hp, Hp)
        "shift": jnp.stack([st, sv]).reshape(2, 1, Hp),  # (2, 1, Hp) f32
        "hidden": H,                                     # static, for slicing
    }


def private_zoom_forward(text_features, image_features, packed):
    """text_features, image_features: (N, H) float32 -> (private_t, private_v)."""
    w = packed["w"]
    shift = packed["shift"]
    H = packed["hidden"]
    N = text_features.shape[0]
    Hp = w.shape[1]

    x_dtype = w.dtype                              # match MXU operand dtype
    ib = jnp.dtype(x_dtype).itemsize
    q = 16 if ib == 2 else 8                       # bf16 packs 2 rows/sublane

    # ---- tile sizes: padding decoupled from tiles; tiles divide padded dims.
    Np = _round_up(N, q)
    tm = Np if Np <= 512 else _largest_tile(Np, 512, q)   # 1 M tile if possible
    tn = _largest_tile(Hp, 1024, 128)
    tk = _largest_tile(Hp, 1024, 128)

    def pad2(a, rows, cols):
        return jnp.pad(a, ((0, rows - a.shape[0]), (0, cols - a.shape[1])))

    # Activations are tiny (N x H); per-call pad/cast is negligible HBM traffic.
    x = jnp.stack([pad2(text_features, Np, Hp),
                   pad2(image_features, Np, Hp)]).astype(x_dtype)   # (2,Np,Hp)

    grid = (2, Np // tm, Hp // tn, Hp // tk)       # reduction (K) axis last

    in_specs = [
        # activations: depend on (branch, row tile, K tile)
        pl.BlockSpec((1, tm, tk), lambda b, i, j, k: (b, i, k)),
        # weights: independent of the row-tile index i -> reused across row
        # tiles (and with tm covering the whole batch, streamed exactly once)
        pl.BlockSpec((1, tn, tk), lambda b, i, j, k: (b, j, k)),
        # fused per-branch shift (Linear bias + BN), f32
        pl.BlockSpec((1, 1, tn), lambda b, i, j, k: (b, 0, j)),
    ]
    out_spec = pl.BlockSpec((1, tm, tn), lambda b, i, j, k: (b, i, j))

    # Scoped-VMEM budget from the actual tiles (double-buffered ins/out),
    # with 2x scheduling headroom, capped at 40 MiB (v7x has 64 MiB physical).
    vmem_bytes = (2 * tm * tk * ib        # x double buffer
                  + 2 * tn * tk * ib      # w double buffer
                  + 2 * tm * tn * 4       # f32 output (resident + writeback)
                  + 2 * tn * 4)           # shift
    vmem_limit = int(min(max(2 * vmem_bytes, 16 << 20), 40 << 20))

    out = pl.pallas_call(
        _zoom_kernel,
        out_shape=jax.ShapeDtypeStruct((2, Np, Hp), jnp.float32),
        grid_spec=pltpu.PrefetchScalarGridSpec(
            num_scalar_prefetch=0,
            grid=grid,
            in_specs=in_specs,
            out_specs=out_spec),
        compiler_params=pltpu.CompilerParams(
            # branch axis first & parallel: on v7x the two TensorCores can each
            # take one Linear+BN branch (text vs image).
            dimension_semantics=("parallel", "parallel", "parallel", "arbitrary"),
            vmem_limit_bytes=vmem_limit),
    )(x, w, shift)

    return out[0, :N, :H], out[1, :N, :H]


def _reference(text_features, image_features, params):
    eps = 1e-5
    scale = params["gamma"] / jnp.sqrt(params["running_var"] + eps)
    shift = params["beta"] - params["running_mean"] * scale

    def branch(x, W, b):
        y = x @ W.T + b
        return y * scale + shift

    return (branch(text_features, params["W_t"], params["b_t"]),
            branch(image_features, params["W_v"], params["b_v"]))


def _init_params(key, hidden_size):
    ks = jax.random.split(key, 6)
    bound = 1.0 / jnp.sqrt(hidden_size)
    return {
        "W_t": jax.random.uniform(ks[0], (hidden_size, hidden_size),
                                  jnp.float32, -bound, bound),
        "b_t": jax.random.uniform(ks[1], (hidden_size,),
                                  jnp.float32, -bound, bound),
        "W_v": jax.random.uniform(ks[2], (hidden_size, hidden_size),
                                  jnp.float32, -bound, bound),
        "b_v": jax.random.uniform(ks[3], (hidden_size,),
                                  jnp.float32, -bound, bound),
        # BatchNorm1d params / running stats (deterministic, non-trivial values).
        "gamma": 1.0 + 0.1 * jax.random.normal(ks[4], (hidden_size,), jnp.float32),
        "beta": 0.05 * jax.random.normal(ks[5], (hidden_size,), jnp.float32),
        "running_mean": jnp.linspace(-0.5, 0.5, hidden_size, dtype=jnp.float32),
        "running_var": jnp.linspace(0.5, 1.5, hidden_size, dtype=jnp.float32),
    }


if __name__ == "__main__":
    key = jax.random.PRNGKey(0)
    k_in, k_param, k_in2, k_param2 = jax.random.split(key, 4)

    # --- small demo shape (module default scale) ---
    batch, hidden = 8, 32
    k_t, k_v = jax.random.split(k_in)
    text_features = jax.random.normal(k_t, (batch, hidden), jnp.float32)
    image_features = jax.random.normal(k_v, (batch, hidden), jnp.float32)
    params = _init_params(k_param, hidden)
    ref_t, ref_v = _reference(text_features, image_features, params)

    # full-precision pack: tight tolerance
    packed_f32 = pack_private_zoom_params(params, weight_dtype=jnp.float32)
    out_t, out_v = private_zoom_forward(text_features, image_features, packed_f32)
    jax.block_until_ready((out_t, out_v))
    assert jnp.allclose(out_t, ref_t, atol=1e-5, rtol=1e-5)
    assert jnp.allclose(out_v, ref_v, atol=1e-5, rtol=1e-5)

    # default bf16 pack (halves the dominant weight HBM traffic); f32 accumulation
    packed_bf16 = pack_private_zoom_params(params)
    bt, bv = private_zoom_forward(text_features, image_features, packed_bf16)
    jax.block_until_ready((bt, bv))
    assert jnp.allclose(bt, ref_t, atol=1e-1, rtol=1e-1)
    assert jnp.allclose(bv, ref_v, atol=1e-1, rtol=1e-1)

    # --- non-power-of-two hidden dim: exercises 128-only padding, K tiling path ---
    batch2, hidden2 = 24, 640
    k_t2, k_v2 = jax.random.split(k_in2)
    tf2 = jax.random.normal(k_t2, (batch2, hidden2), jnp.float32)
    if2 = jax.random.normal(k_v2, (batch2, hidden2), jnp.float32)
    params2 = _init_params(k_param2, hidden2)
    r_t2, r_v2 = _reference(tf2, if2, params2)

    packed2_f32 = pack_private_zoom_params(params2, weight_dtype=jnp.float32)
    o_t2, o_v2 = private_zoom_forward(tf2, if2, packed2_f32)
    jax.block_until_ready((o_t2, o_v2))
    assert jnp.allclose(o_t2, r_t2, atol=1e-4, rtol=1e-4)
    assert jnp.allclose(o_v2, r_v2, atol=1e-4, rtol=1e-4)

    packed2_bf16 = pack_private_zoom_params(params2)
    b_t2, b_v2 = private_zoom_forward(tf2, if2, packed2_bf16)
    jax.block_until_ready((b_t2, b_v2))
    assert jnp.allclose(b_t2, r_t2, atol=1e-1, rtol=1e-1)
    assert jnp.allclose(b_v2, r_v2, atol=1e-1, rtol=1e-1)

    print("KERNEL_OK")
</pallas_src>

<mosaic_0001>
module attributes {stable_mosaic.version = 11 : i64} {
  func.func @_zoom_kernel(%arg0: i32, %arg1: i32, %arg2: i32, %arg3: i32, %arg4: memref<1x8x128xf32, #tpu.memory_space<vmem>>, %arg5: memref<1x128x128xf32, #tpu.memory_space<vmem>>, %arg6: memref<1x1x128xf32, #tpu.memory_space<vmem>>, %arg7: memref<1x8x128xf32, #tpu.memory_space<vmem>>) attributes {dimension_semantics = [#tpu.dimension_semantics<parallel>, #tpu.dimension_semantics<parallel>, #tpu.dimension_semantics<parallel>, #tpu.dimension_semantics<arbitrary>], iteration_bounds = array<i64: 2, 1, 1, 1>, scalar_prefetch = 0 : i64, scratch_operands = 0 : i64, tpu.core_type = #tpu.core_type<tc>, window_params = [{transform_indices = @transform_0, window_bounds = array<i64: 1, 8, 128>}, {transform_indices = @transform_1, window_bounds = array<i64: 1, 128, 128>}, {transform_indices = @transform_2, window_bounds = array<i64: 1, 1, 128>}, {transform_indices = @transform_3, window_bounds = array<i64: 1, 8, 128>}]} {
    %c0_i32 = arith.constant 0 : i32
    %0 = arith.cmpi eq, %arg3, %c0_i32 : i32
    %1 = arith.extui %0 : i1 to i32
    %c0_i32_0 = arith.constant 0 : i32
    %2 = arith.cmpi ne, %1, %c0_i32_0 : i32
    scf.if %2 {
      %c0_12 = arith.constant 0 : index
      %c0_13 = arith.constant 0 : index
      %c0_14 = arith.constant 0 : index
      %14 = vector.load %arg6[%c0_12, %c0_13, %c0_14] : memref<1x1x128xf32, #tpu.memory_space<vmem>>, vector<1x1x128xf32>
      %15 = vector.shape_cast %14 : vector<1x1x128xf32> to vector<1x128xf32>
      %16 = vector.shape_cast %15 : vector<1x128xf32> to vector<1x128xf32>
      %17 = vector.broadcast %16 : vector<1x128xf32> to vector<8x128xf32>
      %c0_15 = arith.constant 0 : index
      %c0_16 = arith.constant 0 : index
      %c0_17 = arith.constant 0 : index
      %18 = vector.load %arg7[%c0_15, %c0_16, %c0_17] : memref<1x8x128xf32, #tpu.memory_space<vmem>>, vector<1x8x128xf32>
      %19 = vector.shape_cast %18 : vector<1x8x128xf32> to vector<8x128xf32>
      %20 = vector.shape_cast %17 : vector<8x128xf32> to vector<1x8x128xf32>
      tpu.vector_store %arg7[%c0_15, %c0_16, %c0_17], %20 {strides = array<i32>} : memref<1x8x128xf32, #tpu.memory_space<vmem>>, vector<1x8x128xf32>,
    } else {
    }
    %c0 = arith.constant 0 : index
    %c0_1 = arith.constant 0 : index
    %c0_2 = arith.constant 0 : index
    %3 = vector.load %arg7[%c0, %c0_1, %c0_2] : memref<1x8x128xf32, #tpu.memory_space<vmem>>, vector<1x8x128xf32>
    %4 = vector.shape_cast %3 : vector<1x8x128xf32> to vector<8x128xf32>
    %c0_3 = arith.constant 0 : index
    %c0_4 = arith.constant 0 : index
    %c0_5 = arith.constant 0 : index
    %5 = vector.load %arg4[%c0_3, %c0_4, %c0_5] : memref<1x8x128xf32, #tpu.memory_space<vmem>>, vector<1x8x128xf32>
    %6 = vector.shape_cast %5 : vector<1x8x128xf32> to vector<8x128xf32>
    %c0_6 = arith.constant 0 : index
    %c0_7 = arith.constant 0 : index
    %c0_8 = arith.constant 0 : index
    %7 = vector.load %arg5[%c0_6, %c0_7, %c0_8] : memref<1x128x128xf32, #tpu.memory_space<vmem>>, vector<1x128x128xf32>
    %8 = vector.shape_cast %7 : vector<1x128x128xf32> to vector<128x128xf32>
    %cst = arith.constant dense<0.000000e+00> : vector<8x128xf32>
    %9 = tpu.matmul %6, %8, %cst {dimension_numbers = #tpu.dot_dimension_numbers<[1], [1], [0], [0], [0, 0, 1, 0], [], []>} : vector<8x128xf32>, vector<128x128xf32>, vector<8x128xf32> -> vector<8x128xf32>
    %10 = arith.addf %4, %9 : vector<8x128xf32>
    %c0_9 = arith.constant 0 : index
    %c0_10 = arith.constant 0 : index
    %c0_11 = arith.constant 0 : index
    %11 = vector.load %arg7[%c0_9, %c0_10, %c0_11] : memref<1x8x128xf32, #tpu.memory_space<vmem>>, vector<1x8x128xf32>
    %12 = vector.shape_cast %11 : vector<1x8x128xf32> to vector<8x128xf32>
    %13 = vector.shape_cast %10 : vector<8x128xf32> to vector<1x8x128xf32>
    tpu.vector_store %arg7[%c0_9, %c0_10, %c0_11], %13 {strides = array<i32>} : memref<1x8x128xf32, #tpu.memory_space<vmem>>, vector<1x8x128xf32>,
    return
  }
  func.func @transform_0(%arg0: i32, %arg1: i32, %arg2: i32, %arg3: i32) -> (i32, i32, i32) {
    %c0_i32 = arith.constant 0 : i32
    return %arg0, %arg1, %arg3 : i32, i32, i32
  }
  func.func @transform_1(%arg0: i32, %arg1: i32, %arg2: i32, %arg3: i32) -> (i32, i32, i32) {
    %c0_i32 = arith.constant 0 : i32
    return %arg0, %arg2, %arg3 : i32, i32, i32
  }
  func.func @transform_2(%arg0: i32, %arg1: i32, %arg2: i32, %arg3: i32) -> (i32, i32, i32) {
    %c0_i32 = arith.constant 0 : i32
    %c0_i32_0 = arith.constant 0 : i32
    return %arg0, %c0_i32, %arg2 : i32, i32, i32
  }
  func.func @transform_3(%arg0: i32, %arg1: i32, %arg2: i32, %arg3: i32) -> (i32, i32, i32) {
    %c0_i32 = arith.constant 0 : i32
    return %arg0, %arg1, %arg2 : i32, i32, i32
  }
}

</mosaic_0001>

<bundles_post_ra>
// kernel: tpu_custom_call.1
= control target key start
LH: loop header
LB: loop body
LE: loop exit
PB: predicated region body
PF: predicated region fallthrough
CT: control target
= control target key end

     0   :  { %8 = vsyncpa [#allocation3], 0  ;;  %s1136_s0 = inlined_call_operand.hbm [shape: f32[2,8,128], index: 0, kind: input, shape index: {}]   ;;  %s1137_s1 = inlined_call_operand.hbm [shape: f32[2,128,128], index: 1, kind: input, shape index: {}]   ;;  %s1138_s2 = inlined_call_operand.vmem [shape: f32[2,1,128], index: 2, kind: input, shape index: {}]   ;;  %s1139_s3 = inlined_call_operand.hbm [shape: f32[2,8,128], index: 3, kind: output, shape index: {}]  }
   0x1   :  { %10 = vsyncpa [#allocation3 + $0x1], 0 }
   0x2   :  { %11 = vsyncpa [#allocation6], 0 }
   0x3   :  { %13 = vsyncpa [#allocation6 + $0x1], 0 }
   0x4   :  { %14 = vsyncpa [#allocation4], 0 }
   0x5   :  { %16 = vsyncpa [#allocation4 + $0x1], 0  ;;  %s883_s12 = smov 0   ;;  %s885_s13 = smov 0  }
   0x6   :  { %s887_s14 = smov 0   ;;  %s889_s15 = smov 0  }
   0x7   :  { %s891_s16 = smov 0   ;;  %s893_s17 = smov 0  }
   0x8 LB: > { %s540_s18 = sadd.s32 4294967295, %s853_s17   ;;  %s541_s19 = sadd.s32 4294967294, %s853_s17   ;;  %s853_s17 = sphi %s893_s17, %s22_s17   ;;  %s849_s16 = sphi %s891_s16, %s1158_s16   ;;  %s845_s15 = sphi %s889_s15, %s1157_s15   ;;  %s841_s14 = sphi %s887_s14, %s1156_s14   ;;  %s837_s13 = sphi %s885_s13, %s1155_s13   ;;  %s833_s12 = sphi %s883_s12, %s1154_s12  }
   0x9   : > { %s48_s20 = sadd.s32 1, %s849_s16  ;;  %s59_s21 = sadd.s32 1, %s841_s14 }
   0xa   : > { %p50_p0 = scmp.ge.s32.totalorder %s48_s20, 2  ;;  %p66_p1 = scmp.ne.s32.totalorder %s841_s14, %s837_s13 }
   0xb   : > { %p67_p2 = scmp.eq.s32.totalorder %s853_s17, 0  ;;  %p72_p3 = scmp.ne.s32.totalorder %s837_s13, %s833_s12 }
   0xc   : > { %s1160_s20 = smov (%p50_p0, %s48_s20), 0  ;;  %p73_p5 = scmp.eq.s32.totalorder %s540_s18, 0 }
   0xd   : > { %p924_p4 = por %p67_p2, %p66_p1  ;;  %s52_s23 = ssub.s32 %s849_s16, %s1160_s20 }
   0xe   : > { %p158_p6 = scmp.eq.s32.totalorder %s540_s18, 1  ;;  %p57_p7 = scmp.eq.s32.totalorder %s52_s23, 0 }
   0xf   : > { %p930_p8 = por %p73_p5, %p72_p3  ;;  %p164_p10 = scmp.eq.s32.totalorder %s541_s19, 1 }
  0x10   : > { %p934_p9 = por %p158_p6, %p66_p1  ;;  %p652_p13 = scmp.lt.s32.totalorder %s853_s17, 2 }
  0x11   : > { %s1143_s24 = scalar_select %p930_p8, 1, 0 }
  0x12   : > { %s1144_s25 = scalar_select %p934_p9, 1, 0 }
  0x13   : > { %s939_s26 = scalar_select %p57_p7, %s841_s14, %s59_s21  }
  0x14   : > { %p941_p11 = por %p164_p10, %p72_p3  ;;  %s948_s28 = sand.u32 1, %s841_s14  }
  0x15   : > { %s544_s29 = sshll.u32 %s948_s28, 3  ;;  %s545_s30 = sshll.u32 %s849_s16, 7 }
  0x16   : > { %s1145_s27 = scalar_select %p941_p11, 1, 0 }
  0x17   : > { %s955_s6 = scalar_lea.hbm %s1136_s0, %s545_s30  ;;  %s188_s7 = scalar_lea.vmem [#allocation2], %s544_s29 }
  0x18   : > { %s197_s8 = sshll.u32 %s188_s7, 4  ;;  %p961_p0 = pnand %p652_p13, %p924_p4  ;;  %s957_s8 = int_to_ptr.vmem [resolvable:$true] %s197_s8 }
  0x19   : > { %s185_s10 = scalar_lea.sflag [#allocation3], %s948_s28  ;;  %s707_s11 = scalar_lea.hbm %s955_s6, 128 }
  0x1a   : > { %p708_p3 = scmp.ne.s32.totalorder %s955_s6, %s707_s11  ;;  %p709_p5 = pneg %p961_p0 }
  0x1b   : > { %s712_s21 = scalar_lea.hbm %s1136_s0, 256  ;;  %p713_p4 = scmp.lt.u32.totalorder %s955_s6, %s1136_s0 }
  0x1c   : > { %p710_p6 = pnand %p709_p5, %p708_p3  ;;  %p714_p10 = scmp.lt.u32.totalorder %s712_s21, %s707_s11 }
  0x1d   : > { %p716_p12 = scmp.lt.u32.totalorder %s707_s11, %s955_s6 }
  0x1e   : > { %p711_p7 = pneg %p710_p6  ;;  %p715_p13 = por %p714_p10, %p713_p4 }
  0x20   : > { %p717_p1 = por %p716_p12, %p715_p13 }
  0x22   : > { %p718_p2 = pnand %p717_p1, %p711_p7 }
  0x24   : > { %721 = shalt.err (!%p718_p2)
}
  0x25   : > { %s722_s29 = scalar_lea.vmem %s957_s8, 128  ;;  %s855_s30 = smov [#allocation2]  }
  0x26   : > { %p723_p3 = scmp.ne.s32.totalorder %s957_s8, %s722_s29  ;;  %s727_s4 = sshll.u32 %s855_s30, 4  ;;  %s728_s4 = int_to_ptr.vmem [resolvable:$false] %s727_s4 }
  0x27   : > { %s729_s5 = scalar_lea.vmem %s728_s4, 256  ;;  %p730_p9 = scmp.lt.s32.totalorder %s957_s8, %s728_s4 }
  0x28   : > { %p725_p6 = pnand %p723_p3, %p709_p5  ;;  %p731_p4 = scmp.lt.s32.totalorder %s729_s5, %s722_s29 }
  0x2a   : > { %p726_p11 = pneg %p725_p6  ;;  %p732_p10 = por %p731_p4, %p730_p9 }
  0x2c   : > { %p733_p12 = pnand %p732_p10, %p726_p11 }
  0x2e   : > { %736 = shalt.err (!%p733_p12)
}
  0x2f   : > { %644 = dma.hbm_to_vmem [thread:$0]  (!%p961_p0), %s955_s6, 128, %s957_s8, %s185_s10  }
  0x30   : > { %p1147_p1 = scmp.lt.s32.totalorder %s853_s17, 3  ;;  %p1148_p2 = scmp.ge.s32.totalorder %s853_s17, 1 }
  0x31   : > { %s546_s11 = sshll.u32 %s948_s28, 7  ;;  %s558_s18 = sshll.u32 %s849_s16, 11 }
  0x32   : > { %p997_p7 = pnand %p1148_p2, %p1147_p1  ;;  %s1006_s22 = scalar_lea.hbm %s1137_s1, %s558_s18 }
  0x33   : > { %s208_s23 = scalar_lea.vmem [#allocation5], %s546_s11  ;;  %s205_s6 = scalar_lea.sflag [#allocation6], %s948_s28 }
  0x34   : > { %s218_s29 = sshll.u32 %s208_s23, 4  ;;  %s737_s8 = scalar_lea.hbm %s1006_s22, 2048  ;;  %s1008_s29 = int_to_ptr.vmem [resolvable:$true] %s218_s29 }
  0x35   : > { %p738_p9 = scmp.ne.s32.totalorder %s1006_s22, %s737_s8  ;;  %s742_s4 = scalar_lea.hbm %s1137_s1, 4096 }
  0x36   : > { %p743_p3 = scmp.lt.u32.totalorder %s1006_s22, %s1137_s1  ;;  %p744_p6 = scmp.lt.u32.totalorder %s742_s4, %s737_s8 }
  0x37   : > { %p740_p11 = pnand %p738_p9, %p709_p5  ;;  %p746_p10 = scmp.lt.u32.totalorder %s737_s8, %s1006_s22 }
  0x38   : > { %p745_p4 = por %p744_p6, %p743_p3 }
  0x39   : > { %p741_p13 = pneg %p740_p11 }
  0x3a   : > { %p747_p12 = por %p746_p10, %p745_p4 }
  0x3c   : > { %p748_p1 = pnand %p747_p12, %p741_p13 }
  0x3e   : > { %751 = shalt.err (!%p748_p1)
}
  0x3f   : > { %s752_s11 = scalar_lea.vmem %s1008_s29, 2048  ;;  %s856_s19 = smov [#allocation5]  }
  0x40   : > { %p753_p2 = scmp.ne.s32.totalorder %s1008_s29, %s752_s11  ;;  %s757_s21 = sshll.u32 %s856_s19, 4  ;;  %s758_s21 = int_to_ptr.vmem [resolvable:$false] %s757_s21 }
  0x41   : > { %s759_s23 = scalar_lea.vmem %s758_s21, 4096  ;;  %p760_p8 = scmp.lt.s32.totalorder %s1008_s29, %s758_s21 }
  0x42   : > { %p755_p9 = pnand %p753_p2, %p709_p5  ;;  %p761_p3 = scmp.lt.s32.totalorder %s759_s23, %s752_s11 }
  0x44   : > { %p756_p11 = pneg %p755_p9  ;;  %p762_p6 = por %p761_p3, %p760_p8 }
  0x46   : > { %p763_p4 = pnand %p762_p6, %p756_p11 }
  0x48   : > { %766 = shalt.err (!%p763_p4)
}
  0x49   : > { %s857_s8 = smov 128   ;;  %s858_s10 = smov 8  }
  0x4a   : > { %647 = dma.hbm_to_vmem [thread:$0]  (!%p961_p0), %s1006_s22, 2048, %s1008_s29, %s205_s6, %s857_s8, %s857_s8, %s858_s10  }
  0x4b   : > { %239 = sbr.rel (%p997_p7) target bundleno = 380 (0x17c), region = 32  ;;  %s1039_s30 = sand.u32 (!%p997_p7), 1, %s837_s13  }
  0x4c   : > { %s550_s4 = sshll.u32 (!%p997_p7), %s1039_s30, 3  ;;  %s242_s5 = scalar_lea.sflag (!%p997_p7), [#allocation3], %s1039_s30 }
  0x4d   : > { %s1045_s18 = scalar_lea.vmem (!%p997_p7), [#allocation2], %s550_s4  ;;  %p1150_p8 = scmp.ne.s32.totalorder (!%p997_p7), %s1143_s24, 0 }
  0x52   : > { %820 = dma.done.wait (%p1150_p8), %s242_s5, 128  }
  0x53   : > { %822 = vsyncadd (%p1150_p8), %s242_s5, 4294967168  ;;  %s551_s28 = sshll.u32 %s1039_s30, 7  ;;  %s251_s9 = scalar_lea.sflag [#allocation6], %s1039_s30 }
  0x54   : > { %s1053_s7 = scalar_lea.vmem [#allocation5], %s551_s28 }
  0x55   : > { %824 = dma.done.wait (%p1150_p8), %s251_s9, 2048  }
  0x56   : > { %826 = vsyncadd (%p1150_p8), %s251_s9, 4294965248  ;;  %v859_v0 = vmov 0.0|0.0   ;;  %vm860_vm0 = vmmov 0   ;;  %v861_v1 = vmov 0.0   ;;  %v309_v2 = vld [vmem:[%s1053_s7] sm:$0xff]  ;;  %v310_v3 = vld [vmem:[%s1053_s7 + $0x8] sm:$0xff] }
  0x57   : > { %611 = vmatprep.subr.bf16.mxu0 %v859_v0  ;;  %608 = vmatprep.mubr.msk.f32.mxu0 %vm860_vm0, %v861_v1  ;;  %v612_v4 = vpack.c.bf16 %v310_v3, %v309_v2  ;;  %v311_v5 = vld [vmem:[%s1053_s7 + $0x10] sm:$0xff]  ;;  %v312_v6 = vld [vmem:[%s1053_s7 + $0x18] sm:$0xff]  ;;  %v313_v8 = vld [vmem:[%s1053_s7 + $0x20] sm:$0xff]  ;;  %p289_p0 = scmp.lt.s32.totalorder %s845_s15, 1  ;;  %s555_s11 = sshll.u32 %s845_s15, 7 }
  0x58   : > { %v615_v7 = vpack.c.bf16 %v312_v6, %v311_v5  ;;  %v314_v9 = vld [vmem:[%s1053_s7 + $0x28] sm:$0xff]  ;;  %v315_v11 = vld [vmem:[%s1053_s7 + $0x30] sm:$0xff]  ;;  %v316_v12 = vld [vmem:[%s1053_s7 + $0x38] sm:$0xff]  ;;  %s287_s19 = scalar_lea.vmem [#allocation7], %s550_s4  ;;  %s1087_s10 = scalar_lea.hbm %s1139_s3, %s555_s11 }
  0x59   : > { %613 = vmatpush3.bf16.xpose.msra.mxu0 %v612_v4  ;;  %v618_v10 = vpack.c.bf16 %v314_v9, %v313_v8  ;;  %v621_v13 = vpack.c.bf16 %v316_v12, %v315_v11  ;;  %v317_v14 = vld [vmem:[%s1053_s7 + $0x40] sm:$0xff]  ;;  %v318_v15 = vld [vmem:[%s1053_s7 + $0x48] sm:$0xff]  ;;  %v319_v17 = vld [vmem:[%s1053_s7 + $0x50] sm:$0xff]  ;;  %s290_s24 = scalar_select %p289_p0, %s845_s15, 1 }
  0x5a   : > { %614 = vmatprep.subr.bf16.mxu0 %v859_v0  ;;  %v624_v16 = vpack.c.bf16 %v318_v15, %v317_v14  ;;  %v320_v18 = vld [vmem:[%s1053_s7 + $0x58] sm:$0xff]  ;;  %v321_v20 = vld [vmem:[%s1053_s7 + $0x60] sm:$0xff]  ;;  %v322_v21 = vld [vmem:[%s1053_s7 + $0x68] sm:$0xff]  ;;  %s413_s21 = sshll.u32 %s287_s19, 4  ;;  %s398_s5 = scalar_lea.sflag [#allocation4], %s1039_s30  ;;  %s1089_s21 = int_to_ptr.vmem [resolvable:$true] %s413_s21 }
  0x5b   : > { %v627_v19 = vpack.c.bf16 %v320_v18, %v319_v17  ;;  %v630_v22 = vpack.c.bf16 %v322_v21, %v321_v20  ;;  %v323_v23 = vld [vmem:[%s1053_s7 + $0x70] sm:$0xff]  ;;  %v324_v24 = vld [vmem:[%s1053_s7 + $0x78] sm:$0xff]  ;;  %s294_s6 = scalar_lea.vmem %s1138_s2, %s290_s24  ;;  %p1151_p7 = scmp.ne.s32.totalorder %s1144_s25, 0 }
  0x5c   : > { %v633_v25 = vpack.c.bf16 %v324_v24, %v323_v23  ;;  %v308_v26 = vld [vmem:[%s1045_s18] sm:$0xff]  ;;  %s767_s18 = scalar_lea.vmem %s1089_s21, 128  ;;  %s862_s15 = smov [#allocation7]  }
  0x5d   : > { %v553_v27 = vld [vmem:[%s294_s6] ss:$0 sm:$0xff]  ;;  %p768_p5 = scmp.ne.s32.totalorder %s1089_s21, %s767_s18  ;;  %s771_s4 = sshll.u32 %s862_s15, 4  ;;  %s772_s4 = int_to_ptr.vmem [resolvable:$false] %s771_s4 }
  0x5e   : > { %s773_s28 = scalar_lea.vmem %s772_s4, 256  ;;  %p774_p12 = scmp.lt.s32.totalorder %s1089_s21, %s772_s4 }
  0x5f   : > { %p769_p13 = pnand %p768_p5, %p1151_p7  ;;  %p775_p1 = scmp.lt.s32.totalorder %s773_s28, %s767_s18 }
  0x61   : > { %616 = vmatpush3.bf16.xpose.msra.mxu0 %v615_v7  ;;  %p770_p10 = pneg %p769_p13  ;;  %p776_p2 = por %p775_p1, %p774_p12 }
  0x62   : > { %617 = vmatprep.subr.bf16.mxu0 %v859_v0 }
  0x63   : > { %p777_p9 = pnand %p776_p2, %p770_p10 }
  0x69   : > { %619 = vmatpush3.bf16.xpose.msra.mxu0 %v618_v10 }
  0x6a   : > { %620 = vmatprep.subr.bf16.mxu0 %v859_v0 }
  0x71   : > { %622 = vmatpush3.bf16.xpose.msra.mxu0 %v621_v13 }
  0x72   : > { %623 = vmatprep.subr.bf16.mxu0 %v859_v0 }
  0x79   : > { %625 = vmatpush3.bf16.xpose.msra.mxu0 %v624_v16 }
  0x7a   : > { %626 = vmatprep.subr.bf16.mxu0 %v859_v0 }
  0x81   : > { %628 = vmatpush3.bf16.xpose.msra.mxu0 %v627_v19 }
  0x82   : > { %629 = vmatprep.subr.bf16.mxu0 %v859_v0 }
  0x89   : > { %631 = vmatpush3.bf16.xpose.msra.mxu0 %v630_v22 }
  0x8a   : > { %632 = vmatprep.subr.bf16.mxu0 %v859_v0 }
  0x91   : > { %634 = vmatpush3.bf16.xpose.msra.mxu0 %v633_v25 }
  0x98   : > { %609 = vmatmul.mubr.f32.vlgmr.msra.gmra.mrb[0].mxu0 %v308_v26 }
 0x16b   : > { %v391_v28 = vpop.f32.mrb[0].mxu0 }
 0x16c   : > { %v395_v29 = vadd.f32 %v553_v27, %v391_v28  ;;  %v610_v30 = vpop.f32.mrb[1].mxu0 }
 0x16e   : > { %396 = vst [vmem:[%s287_s19] sm:$0xff] %v395_v29 }
 0x16f   : > { %780 = shalt.err (!%p777_p9)
}
 0x170   : > { %s781_s30 = scalar_lea.hbm %s1087_s10, 128  ;;  %s785_s24 = scalar_lea.hbm %s1139_s3, 256 }
 0x171   : > { %p782_p11 = scmp.ne.s32.totalorder %s1087_s10, %s781_s30  ;;  %p786_p4 = scmp.lt.u32.totalorder %s1087_s10, %s1139_s3 }
 0x172   : > { %p787_p8 = scmp.lt.u32.totalorder %s785_s24, %s781_s30  ;;  %p789_p5 = scmp.lt.u32.totalorder %s781_s30, %s1087_s10 }
 0x173   : > { %p783_p3 = pnand %p782_p11, %p1151_p7 }
 0x174   : > { %p788_p0 = por %p787_p8, %p786_p4 }
 0x175   : > { %p784_p6 = pneg %p783_p3 }
 0x176   : > { %p790_p13 = por %p789_p5, %p788_p0 }
 0x178   : > { %p791_p10 = pnand %p790_p13, %p784_p6 }
 0x17a   : > { %794 = shalt.err (!%p791_p10)
}
 0x17b   : > { %639 = dma.vmem_to_hbm [thread:$0]  (%p1151_p7), %s1089_s21, 128, %s1087_s10, %s398_s5  }
 0x17c PF: > { %s425_s6 = sand.u32 1, %s833_s12   ;;  %p1152_p12 = scmp.ne.s32.totalorder %s1145_s27, 0 }
 0x17d   : > { %p1153_p1 = scmp.ge.s32.totalorder %s853_s17, 2  ;;  %s426_s11 = scalar_lea.sflag [#allocation4], %s425_s6 }
 0x17f   : > { %p649_p2 = pnand %p1153_p1, %p1152_p12 }
 0x181   : > { %828 = dma.done.wait (!%p649_p2), %s426_s11, 128  }
 0x182   : > { %830 = vsyncadd (!%p649_p2), %s426_s11, 4294967168  ;;  %s22_s17 = sadd.s32 1, %s853_s17   ;;  %s1154_s12 = smov %s837_s13 }
 0x183   : > { %p19_p9 = scmp.ge.s32.totalorder %s22_s17, 4   ;;  %s1155_s13 = smov %s841_s14 }
 0x184   : > { %s1156_s14 = smov %s939_s26  ;;  %s1157_s15 = smov %s849_s16 }
 0x185   : > { %s1158_s16 = smov %s1160_s20  ;;  %21 = sbr.rel (!%p19_p9) target bundleno = 8 (0x8), region = 97 }
 0x18c   :  { %431 = vsyncpa [#allocation3], 1 }
 0x18d   :  { %433 = vsyncpa [#allocation3 + $0x1], 1 }
 0x18e   :  { %434 = vsyncpa [#allocation6], 1 }
 0x18f   :  { %436 = vsyncpa [#allocation6 + $0x1], 1 }
 0x190   :  { %437 = vsyncpa [#allocation4], 1 }
 0x191   :  { %439 = vsyncpa [#allocation4 + $0x1], 1 }

</bundles_post_ra>
